<compile_context>
chip_gen: v7x
topology: tpu7x:2x2x1
jax: 0.10.0
libtpu: 0.0.40
codegen_flags: <defaults>
</compile_context>

<pallas_src>
import functools

import jax
import jax.numpy as jnp
from jax import lax
from jax.experimental import pallas as pl
from jax.experimental.pallas import tpu as pltpu

MAX_LANE_TILE = 32768            # rows per grid step (lane axis), multiple of 128
VMEM_LIMIT_BYTES = 32 * 1024 * 1024


def _round_up(x, m):
    return ((x + m - 1) // m) * m


@functools.lru_cache(maxsize=1)
def _default_num_cores():
    # Only v7x has 2 TensorCores per chip; a core split on v5e/v6e is overhead.
    try:
        kind = jax.devices()[0].device_kind.lower()
    except Exception:
        return 1
    return 2 if ("v7" in kind or "tpu7" in kind) else 1


def _masked_ce_kernel(pred_ref, tgt_ref, segmask_ref, acc_ref):
    """Accumulate per-segment, lane-wide CE partial sums.

    pred_ref    : (D, L) logits tile — classes on sublanes, rows on lanes.
    tgt_ref     : (1, L) int32 target class index per row.
    segmask_ref : (S, L) int8; segmask[s, r] = 1 iff row r belongs to segment s
                  AND is selected by that segment's mask.
    acc_ref     : (1, S, L) float32 accumulator, resident across the row grid
                  axis (one output row per core).
    """
    @pl.when(pl.program_id(1) == 0)
    def _():
        acc_ref[...] = jnp.zeros_like(acc_ref)

    pred = pred_ref[...].astype(jnp.float32)              # (D, L)
    tgt = tgt_ref[...]                                     # (1, L) int32
    seg = segmask_ref[...].astype(jnp.float32)             # (S, L)

    # lanes that matter at all (also kills garbage lanes of ragged boundary tiles)
    valid = jnp.max(seg, axis=0, keepdims=True) > 0.0      # (1, L)

    # stable logsumexp over the class (sublane) axis — cheap sublane reductions
    row_max = jnp.max(pred, axis=0, keepdims=True)         # (1, L)
    lse = row_max + jnp.log(jnp.sum(jnp.exp(pred - row_max), axis=0, keepdims=True))

    # target logit: select-by-index along sublanes (no one-hot stream needed)
    cls = lax.broadcasted_iota(jnp.int32, pred.shape, 0)   # (D, L)
    tgt_logit = jnp.sum(jnp.where(cls == tgt, pred, 0.0), axis=0, keepdims=True)

    # where is a select: NaN/Inf from out-of-bounds boundary lanes never propagates;
    # keep this select AHEAD of any lane reduction (done once in the XLA wrapper).
    ce = jnp.where(valid, lse - tgt_logit, 0.0)             # (1, L)
    acc_ref[...] = acc_ref[...] + (ce * seg)[None]          # (1, S, L)


def masked_ce_sums(pred_t, tgt_idx, seg_masks, *, max_lane_tile=MAX_LANE_TILE,
                   num_cores=None):
    """Per-segment sums of masked cross-entropy.

    pred_t    : (D, N)  transposed logits (classes on dim 0), native dtype
                (upcast happens inside the kernel; feed bf16 to halve traffic).
    tgt_idx   : (N,)    integer target class per row.
    seg_masks : (S, N)  per-segment row masks (any int/bool dtype).
    Returns (S,) float32: sum_r segmask[s, r] * CE(pred[:, r], tgt[r]).
    """
    d, n_rows = pred_t.shape
    s = seg_masks.shape[0]
    if num_cores is None:
        num_cores = _default_num_cores()

    lane_tile = min(max_lane_tile, _round_up(n_rows, 128))
    n_tiles = pl.cdiv(n_rows, lane_tile)
    num_cores = max(1, min(num_cores, n_tiles))
    tiles_per_core = pl.cdiv(n_tiles, num_cores)
    n_tiles_pad = num_cores * tiles_per_core
    n_pad = n_tiles_pad * lane_tile

    tgt_idx = tgt_idx.reshape(1, n_rows).astype(jnp.int32)

    # Only the (int8, tiny) mask is padded; pred/tgt are never copied in HBM here.
    seg_masks = seg_masks.astype(jnp.int8)
    if n_pad != n_rows:
        seg_masks = jnp.pad(seg_masks, ((0, 0), (0, n_pad - n_rows)))

    def data_map(c, i):
        # clamp: fully-out-of-range tiles re-read the last real tile (masked to zero)
        return (0, jnp.minimum(c * tiles_per_core + i, n_tiles - 1))

    def mask_map(c, i):
        return (0, c * tiles_per_core + i)

    itemsize = jnp.dtype(pred_t.dtype).itemsize
    cost = pl.CostEstimate(
        flops=int(8 * d * n_rows),
        transcendentals=int((d + 1) * n_rows),
        bytes_accessed=int(d * n_rows * itemsize        # pred
                           + 4 * n_rows                 # int32 targets
                           + s * n_pad                  # int8 masks
                           + num_cores * s * lane_tile * 4),  # accumulator out
    )

    if num_cores > 1:
        # real 2-TensorCore split on v7x (plain "parallel" doesn't change codegen)
        semantics = (pltpu.CORE_PARALLEL, pltpu.ARBITRARY)
    else:
        semantics = (pltpu.ARBITRARY, pltpu.ARBITRARY)

    acc = pl.pallas_call(
        _masked_ce_kernel,
        out_shape=jax.ShapeDtypeStruct((num_cores, s, lane_tile), jnp.float32),
        grid_spec=pltpu.PrefetchScalarGridSpec(
            num_scalar_prefetch=0,
            grid=(num_cores, tiles_per_core),
            in_specs=[
                pl.BlockSpec((d, lane_tile), data_map),
                pl.BlockSpec((1, lane_tile), data_map),
                pl.BlockSpec((s, lane_tile), mask_map),
            ],
            out_specs=pl.BlockSpec((1, s, lane_tile), lambda c, i: (c, 0, 0)),
        ),
        compiler_params=pltpu.CompilerParams(
            dimension_semantics=semantics,
            vmem_limit_bytes=VMEM_LIMIT_BYTES),
        cost_estimate=cost,
    )(pred_t, tgt_idx, seg_masks)

    # single cross-lane collapse (tiny), done once in XLA
    return jnp.sum(acc, axis=(0, 2))


def _safe_mean(ce_sum, count):
    # torch would skip the term when numel == 0; we return 0 for an empty mask.
    return jnp.where(count > 0, ce_sum / jnp.maximum(count, 1.0), 0.0)


def val_loss(lambda_val, pred_X, pred_charges, pred_E, pred_y,
             true_X, true_charges, true_E, true_y, node_mask):
    """JAX/Pallas equivalent of ValLoss.forward. Returns (batch_loss, to_log)."""
    bs, n = node_mask.shape
    dx = pred_X.shape[-1]
    dc = pred_charges.shape[-1]
    de = pred_E.shape[-1]
    dy = pred_y.shape[-1]

    nodes_i8 = node_mask.reshape(bs * n).astype(jnp.int8)
    eye = jnp.eye(n, dtype=bool)
    edge_mask = (~eye)[None] & node_mask[:, :, None] & node_mask[:, None, :]
    edges_i8 = edge_mask.reshape(bs * n * n).astype(jnp.int8)

    # ---- E (the big tensor): its own call, native pred dtype, rows -> lanes.
    # One-hot true_E never enters the kernel: argmax once in XLA -> int32 index.
    pred_E_t = pred_E.reshape(bs * n * n, de).T            # (de, bs*n*n)
    tgt_E = jnp.argmax(true_E.reshape(bs * n * n, de), axis=-1)
    sum_E = masked_ce_sums(pred_E_t, tgt_E, edges_i8[None, :])[0]
    # analytic count: k_b valid nodes -> k_b*(k_b-1) off-diagonal valid edges
    k_b = jnp.sum(node_mask.astype(jnp.float32), axis=1)
    cnt_E = jnp.sum(k_b * (k_b - 1.0))

    # ---- X / charges / y: tiny -> fuse into ONE pallas_call via segment masks.
    d_small = max(dx, dc, dy)

    def prep(p):
        p_t = p.reshape(-1, p.shape[-1]).T.astype(jnp.float32)
        pad = d_small - p_t.shape[0]
        if pad:
            # padded classes: huge negative logit (exp -> 0)
            p_t = jnp.pad(p_t, ((0, pad), (0, 0)), constant_values=-1e9)
        return p_t

    pX_t = prep(pred_X)
    pC_t = prep(pred_charges)
    pY_t = prep(pred_y)
    tX = jnp.argmax(true_X.reshape(-1, dx), axis=-1)
    tC = jnp.argmax(true_charges.reshape(-1, dc), axis=-1)
    tY = jnp.argmax(true_y.reshape(-1, dy), axis=-1)

    nX = nC = bs * n
    nY = bs

    pred_small = jnp.concatenate([pX_t, pC_t, pY_t], axis=1)   # (d_small, n_small)
    tgt_small = jnp.concatenate([tX, tC, tY], axis=0)          # (n_small,)

    z8 = lambda k: jnp.zeros((k,), jnp.int8)
    seg = jnp.stack([
        jnp.concatenate([nodes_i8, z8(nC + nY)]),
        jnp.concatenate([z8(nX), nodes_i8, z8(nY)]),
        jnp.concatenate([z8(nX + nC), jnp.ones((nY,), jnp.int8)]),
    ])                                                          # (3, n_small) int8

    sums_small = masked_ce_sums(pred_small, tgt_small, seg)
    sum_X, sum_C, sum_Y = sums_small[0], sums_small[1], sums_small[2]
    cnt_X = jnp.sum(node_mask.astype(jnp.float32))
    cnt_C = cnt_X
    cnt_Y = jnp.asarray(nY, jnp.float32)

    loss_X = _safe_mean(sum_X, cnt_X)
    loss_charges = _safe_mean(sum_C, cnt_C)
    loss_E = _safe_mean(sum_E, cnt_E)
    loss_y = _safe_mean(sum_Y, cnt_Y)

    lam = jnp.asarray(lambda_val, jnp.float32)
    batch_loss = (lam[1] * loss_X + lam[2] * loss_charges
                  + lam[3] * loss_E + lam[4] * loss_y)

    to_log = {
        'val_loss/X_CE': lam[1] * loss_X,
        'val_loss/charges_CE': lam[2] * loss_charges,
        'val_loss/E_CE': lam[3] * loss_E,
        'val_loss/y_CE': lam[4] * loss_y,
        'val_loss/batch_loss': batch_loss,
    }
    # TODO(synk): wandb logging / torchmetrics running-state accumulation is host-side, not a kernel.
    return batch_loss, to_log


def _ref_masked_ce(pred, true, mask):
    """Pure-JAX reference for correctness checking."""
    pred = pred.astype(jnp.float32)
    mask = mask.astype(jnp.float32)
    lse = jax.scipy.special.logsumexp(pred, axis=-1)
    tgt = jnp.argmax(true, axis=-1)
    ce = lse - jnp.take_along_axis(pred, tgt[:, None], axis=-1)[:, 0]
    return jnp.sum(ce * mask), jnp.sum(mask)


if __name__ == "__main__":
    key = jax.random.PRNGKey(0)
    bs, n, dx, dc, de, dy = 2, 8, 5, 3, 5, 8
    lambda_train = [1.0, 1.0, 1.0, 5.0, 0.1]

    ks = jax.random.split(key, 10)
    node_mask = jax.random.bernoulli(ks[0], 0.7, (bs, n))
    node_mask = node_mask.at[:, :2].set(True)

    def onehot_from(k, shape, d):
        idx = jax.random.randint(k, shape, 0, d)
        return jax.nn.one_hot(idx, d, dtype=jnp.float32)

    pred_X = jax.random.normal(ks[1], (bs, n, dx), jnp.float32)
    true_X = onehot_from(ks[2], (bs, n), dx)
    pred_charges = jax.random.normal(ks[3], (bs, n, dc), jnp.float32)
    true_charges = onehot_from(ks[4], (bs, n), dc)
    pred_E = jax.random.normal(ks[5], (bs, n, n, de), jnp.float32)
    true_E = onehot_from(ks[6], (bs, n, n), de)
    pred_y = jax.random.normal(ks[7], (bs, dy), jnp.float32)
    true_y = onehot_from(ks[8], (bs,), dy)

    val_loss_fn = jax.jit(val_loss)
    batch_loss, to_log = val_loss_fn(jnp.asarray(lambda_train, jnp.float32),
                                     pred_X, pred_charges, pred_E, pred_y,
                                     true_X, true_charges, true_E, true_y,
                                     node_mask)
    batch_loss = jax.block_until_ready(batch_loss)

    # pure-JAX reference check
    eye = jnp.eye(n, dtype=bool)
    edge_mask = (~eye)[None] & node_mask[:, :, None] & node_mask[:, None, :]
    rx = _ref_masked_ce(pred_X.reshape(-1, dx), true_X.reshape(-1, dx), node_mask.reshape(-1))
    rc = _ref_masked_ce(pred_charges.reshape(-1, dc), true_charges.reshape(-1, dc),
                        node_mask.reshape(-1))
    re_ = _ref_masked_ce(pred_E.reshape(-1, de), true_E.reshape(-1, de), edge_mask.reshape(-1))
    ry = _ref_masked_ce(pred_y, true_y, jnp.ones((bs,), jnp.float32))
    lam = jnp.asarray(lambda_train, jnp.float32)
    ref = (lam[1] * rx[0] / rx[1] + lam[2] * rc[0] / rc[1]
           + lam[3] * re_[0] / re_[1] + lam[4] * ry[0] / ry[1])

    assert jnp.allclose(batch_loss, ref, rtol=1e-5, atol=1e-4), (batch_loss, ref)
    print("KERNEL_OK")
</pallas_src>

<mosaic_0001>
module attributes {stable_mosaic.version = 11 : i64} {
  func.func @_masked_ce_kernel(%arg0: i32, %arg1: i32, %arg2: memref<8x128xf32, #tpu.memory_space<vmem>>, %arg3: memref<1x128xi32, #tpu.memory_space<vmem>>, %arg4: memref<3x128xi8, #tpu.memory_space<vmem>>, %arg5: memref<1x3x128xf32, #tpu.memory_space<vmem>>) attributes {dimension_semantics = [#tpu.dimension_semantics<arbitrary>, #tpu.dimension_semantics<arbitrary>], iteration_bounds = array<i64: 1, 1>, scalar_prefetch = 0 : i64, scratch_operands = 0 : i64, tpu.core_type = #tpu.core_type<tc>, window_params = [{transform_indices = @transform_0, window_bounds = array<i64: 8, 128>}, {transform_indices = @transform_1, window_bounds = array<i64: 1, 128>}, {transform_indices = @transform_2, window_bounds = array<i64: 3, 128>}, {transform_indices = @transform_3, window_bounds = array<i64: 1, 3, 128>}]} {
    %c0_i32 = arith.constant 0 : i32
    %0 = arith.cmpi eq, %arg1, %c0_i32 : i32
    %1 = arith.extui %0 : i1 to i32
    %c0_i32_0 = arith.constant 0 : i32
    %2 = arith.cmpi ne, %1, %c0_i32_0 : i32
    scf.if %2 {
      %cst_18 = arith.constant 0.000000e+00 : f32
      %36 = vector.broadcast %cst_18 : f32 to vector<1x3x128xf32>
      %c0_19 = arith.constant 0 : index
      %c0_20 = arith.constant 0 : index
      %c0_21 = arith.constant 0 : index
      %37 = vector.load %arg5[%c0_19, %c0_20, %c0_21] : memref<1x3x128xf32, #tpu.memory_space<vmem>>, vector<1x3x128xf32>
      tpu.vector_store %arg5[%c0_19, %c0_20, %c0_21], %36 {strides = array<i32>} : memref<1x3x128xf32, #tpu.memory_space<vmem>>, vector<1x3x128xf32>,
    } else {
    }
    %c0 = arith.constant 0 : index
    %c0_1 = arith.constant 0 : index
    %3 = vector.load %arg2[%c0, %c0_1] : memref<8x128xf32, #tpu.memory_space<vmem>>, vector<8x128xf32>
    %c0_2 = arith.constant 0 : index
    %c0_3 = arith.constant 0 : index
    %4 = vector.load %arg3[%c0_2, %c0_3] : memref<1x128xi32, #tpu.memory_space<vmem>>, vector<1x128xi32>
    %c0_4 = arith.constant 0 : index
    %c0_5 = arith.constant 0 : index
    %5 = vector.load %arg4[%c0_4, %c0_5] : memref<3x128xi8, #tpu.memory_space<vmem>>, vector<3x128xi8>
    %6 = arith.sitofp %5 : vector<3x128xi8> to vector<3x128xf32>
    %cst = arith.constant dense<0xFF800000> : vector<128xf32>
    %7 = vector.multi_reduction <maximumf>, %6, %cst [0] : vector<3x128xf32> to vector<128xf32>
    %8 = vector.shape_cast %7 : vector<128xf32> to vector<1x128xf32>
    %cst_6 = arith.constant 0.000000e+00 : f32
    %9 = vector.broadcast %cst_6 : f32 to vector<1x128xf32>
    %10 = arith.cmpf ogt, %8, %9 : vector<1x128xf32>
    %cst_7 = arith.constant dense<0xFF800000> : vector<128xf32>
    %11 = vector.multi_reduction <maximumf>, %3, %cst_7 [0] : vector<8x128xf32> to vector<128xf32>
    %12 = vector.shape_cast %11 : vector<128xf32> to vector<1x128xf32>
    %13 = vector.broadcast %12 : vector<1x128xf32> to vector<8x128xf32>
    %14 = arith.subf %3, %13 : vector<8x128xf32>
    %15 = math.exp %14 : vector<8x128xf32>
    %cst_8 = arith.constant dense<0.000000e+00> : vector<128xf32>
    %16 = vector.multi_reduction <add>, %15, %cst_8 [0] : vector<8x128xf32> to vector<128xf32>
    %17 = vector.shape_cast %16 : vector<128xf32> to vector<1x128xf32>
    %18 = math.log %17 : vector<1x128xf32>
    %19 = arith.addf %12, %18 : vector<1x128xf32>
    %20 = tpu.iota {dimensions = array<i32: 0>} : vector<8x128xi32>
    %21 = vector.broadcast %4 : vector<1x128xi32> to vector<8x128xi32>
    %22 = arith.cmpi eq, %20, %21 : vector<8x128xi32>
    %cst_9 = arith.constant 0.000000e+00 : f32
    %23 = vector.broadcast %cst_9 : f32 to vector<8x128xf32>
    %24 = arith.select %22, %3, %23 : vector<8x128xi1>, vector<8x128xf32>
    %cst_10 = arith.constant dense<0.000000e+00> : vector<128xf32>
    %25 = vector.multi_reduction <add>, %24, %cst_10 [0] : vector<8x128xf32> to vector<128xf32>
    %26 = vector.shape_cast %25 : vector<128xf32> to vector<1x128xf32>
    %27 = arith.subf %19, %26 : vector<1x128xf32>
    %cst_11 = arith.constant 0.000000e+00 : f32
    %28 = vector.broadcast %cst_11 : f32 to vector<1x128xf32>
    %29 = arith.select %10, %27, %28 : vector<1x128xi1>, vector<1x128xf32>
    %c0_12 = arith.constant 0 : index
    %c0_13 = arith.constant 0 : index
    %c0_14 = arith.constant 0 : index
    %30 = vector.load %arg5[%c0_12, %c0_13, %c0_14] : memref<1x3x128xf32, #tpu.memory_space<vmem>>, vector<1x3x128xf32>
    %31 = vector.broadcast %29 : vector<1x128xf32> to vector<3x128xf32>
    %32 = arith.mulf %31, %6 : vector<3x128xf32>
    %33 = vector.shape_cast %32 : vector<3x128xf32> to vector<1x3x128xf32>
    %34 = arith.addf %30, %33 : vector<1x3x128xf32>
    %c0_15 = arith.constant 0 : index
    %c0_16 = arith.constant 0 : index
    %c0_17 = arith.constant 0 : index
    %35 = vector.load %arg5[%c0_15, %c0_16, %c0_17] : memref<1x3x128xf32, #tpu.memory_space<vmem>>, vector<1x3x128xf32>
    tpu.vector_store %arg5[%c0_15, %c0_16, %c0_17], %34 {strides = array<i32>} : memref<1x3x128xf32, #tpu.memory_space<vmem>>, vector<1x3x128xf32>,
    return
  }
  func.func @transform_0(%arg0: i32, %arg1: i32) -> (i32, i32) {
    %c1_i32 = arith.constant 1 : i32
    %0 = arith.muli %arg0, %c1_i32 : i32
    %1 = arith.addi %0, %arg1 : i32
    %c0_i32 = arith.constant 0 : i32
    %2 = arith.minsi %1, %c0_i32 : i32
    %c0_i32_0 = arith.constant 0 : i32
    %c0_i32_1 = arith.constant 0 : i32
    return %c0_i32_0, %2 : i32, i32
  }
  func.func @transform_1(%arg0: i32, %arg1: i32) -> (i32, i32) {
    %c1_i32 = arith.constant 1 : i32
    %0 = arith.muli %arg0, %c1_i32 : i32
    %1 = arith.addi %0, %arg1 : i32
    %c0_i32 = arith.constant 0 : i32
    %2 = arith.minsi %1, %c0_i32 : i32
    %c0_i32_0 = arith.constant 0 : i32
    %c0_i32_1 = arith.constant 0 : i32
    return %c0_i32_0, %2 : i32, i32
  }
  func.func @transform_2(%arg0: i32, %arg1: i32) -> (i32, i32) {
    %c1_i32 = arith.constant 1 : i32
    %0 = arith.muli %arg0, %c1_i32 : i32
    %1 = arith.addi %0, %arg1 : i32
    %c0_i32 = arith.constant 0 : i32
    %c0_i32_0 = arith.constant 0 : i32
    return %c0_i32, %1 : i32, i32
  }
  func.func @transform_3(%arg0: i32, %arg1: i32) -> (i32, i32, i32) {
    %c0_i32 = arith.constant 0 : i32
    %c0_i32_0 = arith.constant 0 : i32
    %c0_i32_1 = arith.constant 0 : i32
    return %arg0, %c0_i32, %c0_i32_0 : i32, i32, i32
  }
}

module attributes {stable_mosaic.version = 11 : i64} {
  func.func @_masked_ce_kernel(%arg0: i32, %arg1: i32, %arg2: memref<5x128xf32, #tpu.memory_space<vmem>>, %arg3: memref<1x128xi32, #tpu.memory_space<vmem>>, %arg4: memref<1x128xi8, #tpu.memory_space<vmem>>, %arg5: memref<1x1x128xf32, #tpu.memory_space<vmem>>) attributes {dimension_semantics = [#tpu.dimension_semantics<arbitrary>, #tpu.dimension_semantics<arbitrary>], iteration_bounds = array<i64: 1, 1>, scalar_prefetch = 0 : i64, scratch_operands = 0 : i64, tpu.core_type = #tpu.core_type<tc>, window_params = [{transform_indices = @transform_0, window_bounds = array<i64: 5, 128>}, {transform_indices = @transform_1, window_bounds = array<i64: 1, 128>}, {transform_indices = @transform_2, window_bounds = array<i64: 1, 128>}, {transform_indices = @transform_3, window_bounds = array<i64: 1, 1, 128>}]} {
    %c0_i32 = arith.constant 0 : i32
    %0 = arith.cmpi eq, %arg1, %c0_i32 : i32
    %1 = arith.extui %0 : i1 to i32
    %c0_i32_0 = arith.constant 0 : i32
    %2 = arith.cmpi ne, %1, %c0_i32_0 : i32
    scf.if %2 {
      %cst_18 = arith.constant 0.000000e+00 : f32
      %35 = vector.broadcast %cst_18 : f32 to vector<1x1x128xf32>
      %c0_19 = arith.constant 0 : index
      %c0_20 = arith.constant 0 : index
      %c0_21 = arith.constant 0 : index
      %36 = vector.load %arg5[%c0_19, %c0_20, %c0_21] : memref<1x1x128xf32, #tpu.memory_space<vmem>>, vector<1x1x128xf32>
      tpu.vector_store %arg5[%c0_19, %c0_20, %c0_21], %35 {strides = array<i32>} : memref<1x1x128xf32, #tpu.memory_space<vmem>>, vector<1x1x128xf32>,
    } else {
    }
    %c0 = arith.constant 0 : index
    %c0_1 = arith.constant 0 : index
    %3 = vector.load %arg2[%c0, %c0_1] : memref<5x128xf32, #tpu.memory_space<vmem>>, vector<5x128xf32>
    %c0_2 = arith.constant 0 : index
    %c0_3 = arith.constant 0 : index
    %4 = vector.load %arg3[%c0_2, %c0_3] : memref<1x128xi32, #tpu.memory_space<vmem>>, vector<1x128xi32>
    %c0_4 = arith.constant 0 : index
    %c0_5 = arith.constant 0 : index
    %5 = vector.load %arg4[%c0_4, %c0_5] : memref<1x128xi8, #tpu.memory_space<vmem>>, vector<1x128xi8>
    %6 = arith.sitofp %5 : vector<1x128xi8> to vector<1x128xf32>
    %cst = arith.constant dense<0xFF800000> : vector<128xf32>
    %7 = vector.multi_reduction <maximumf>, %6, %cst [0] : vector<1x128xf32> to vector<128xf32>
    %8 = vector.shape_cast %7 : vector<128xf32> to vector<1x128xf32>
    %cst_6 = arith.constant 0.000000e+00 : f32
    %9 = vector.broadcast %cst_6 : f32 to vector<1x128xf32>
    %10 = arith.cmpf ogt, %8, %9 : vector<1x128xf32>
    %cst_7 = arith.constant dense<0xFF800000> : vector<128xf32>
    %11 = vector.multi_reduction <maximumf>, %3, %cst_7 [0] : vector<5x128xf32> to vector<128xf32>
    %12 = vector.shape_cast %11 : vector<128xf32> to vector<1x128xf32>
    %13 = vector.broadcast %12 : vector<1x128xf32> to vector<5x128xf32>
    %14 = arith.subf %3, %13 : vector<5x128xf32>
    %15 = math.exp %14 : vector<5x128xf32>
    %cst_8 = arith.constant dense<0.000000e+00> : vector<128xf32>
    %16 = vector.multi_reduction <add>, %15, %cst_8 [0] : vector<5x128xf32> to vector<128xf32>
    %17 = vector.shape_cast %16 : vector<128xf32> to vector<1x128xf32>
    %18 = math.log %17 : vector<1x128xf32>
    %19 = arith.addf %12, %18 : vector<1x128xf32>
    %20 = tpu.iota {dimensions = array<i32: 0>} : vector<5x128xi32>
    %21 = vector.broadcast %4 : vector<1x128xi32> to vector<5x128xi32>
    %22 = arith.cmpi eq, %20, %21 : vector<5x128xi32>
    %cst_9 = arith.constant 0.000000e+00 : f32
    %23 = vector.broadcast %cst_9 : f32 to vector<5x128xf32>
    %24 = arith.select %22, %3, %23 : vector<5x128xi1>, vector<5x128xf32>
    %cst_10 = arith.constant dense<0.000000e+00> : vector<128xf32>
    %25 = vector.multi_reduction <add>, %24, %cst_10 [0] : vector<5x128xf32> to vector<128xf32>
    %26 = vector.shape_cast %25 : vector<128xf32> to vector<1x128xf32>
    %27 = arith.subf %19, %26 : vector<1x128xf32>
    %cst_11 = arith.constant 0.000000e+00 : f32
    %28 = vector.broadcast %cst_11 : f32 to vector<1x128xf32>
    %29 = arith.select %10, %27, %28 : vector<1x128xi1>, vector<1x128xf32>
    %c0_12 = arith.constant 0 : index
    %c0_13 = arith.constant 0 : index
    %c0_14 = arith.constant 0 : index
    %30 = vector.load %arg5[%c0_12, %c0_13, %c0_14] : memref<1x1x128xf32, #tpu.memory_space<vmem>>, vector<1x1x128xf32>
    %31 = arith.mulf %29, %6 : vector<1x128xf32>
    %32 = vector.shape_cast %31 : vector<1x128xf32> to vector<1x1x128xf32>
    %33 = arith.addf %30, %32 : vector<1x1x128xf32>
    %c0_15 = arith.constant 0 : index
    %c0_16 = arith.constant 0 : index
    %c0_17 = arith.constant 0 : index
    %34 = vector.load %arg5[%c0_15, %c0_16, %c0_17] : memref<1x1x128xf32, #tpu.memory_space<vmem>>, vector<1x1x128xf32>
    tpu.vector_store %arg5[%c0_15, %c0_16, %c0_17], %33 {strides = array<i32>} : memref<1x1x128xf32, #tpu.memory_space<vmem>>, vector<1x1x128xf32>,
    return
  }
  func.func @transform_0(%arg0: i32, %arg1: i32) -> (i32, i32) {
    %c1_i32 = arith.constant 1 : i32
    %0 = arith.muli %arg0, %c1_i32 : i32
    %1 = arith.addi %0, %arg1 : i32
    %c0_i32 = arith.constant 0 : i32
    %2 = arith.minsi %1, %c0_i32 : i32
    %c0_i32_0 = arith.constant 0 : i32
    %c0_i32_1 = arith.constant 0 : i32
    return %c0_i32_0, %2 : i32, i32
  }
  func.func @transform_1(%arg0: i32, %arg1: i32) -> (i32, i32) {
    %c1_i32 = arith.constant 1 : i32
    %0 = arith.muli %arg0, %c1_i32 : i32
    %1 = arith.addi %0, %arg1 : i32
    %c0_i32 = arith.constant 0 : i32
    %2 = arith.minsi %1, %c0_i32 : i32
    %c0_i32_0 = arith.constant 0 : i32
    %c0_i32_1 = arith.constant 0 : i32
    return %c0_i32_0, %2 : i32, i32
  }
  func.func @transform_2(%arg0: i32, %arg1: i32) -> (i32, i32) {
    %c1_i32 = arith.constant 1 : i32
    %0 = arith.muli %arg0, %c1_i32 : i32
    %1 = arith.addi %0, %arg1 : i32
    %c0_i32 = arith.constant 0 : i32
    %c0_i32_0 = arith.constant 0 : i32
    return %c0_i32, %1 : i32, i32
  }
  func.func @transform_3(%arg0: i32, %arg1: i32) -> (i32, i32, i32) {
    %c0_i32 = arith.constant 0 : i32
    %c0_i32_0 = arith.constant 0 : i32
    %c0_i32_1 = arith.constant 0 : i32
    return %arg0, %c0_i32, %c0_i32_0 : i32, i32, i32
  }
}

</mosaic_0001>

<bundles_post_ra>
// kernel: val_loss.2
= control target key start
LH: loop header
LB: loop body
LE: loop exit
PB: predicated region body
PF: predicated region fallthrough
CT: control target
= control target key end

     0   :  { %vm90_vm0 = vcmask 1044480   ;;  %v154_v0 = vmov 0.0   ;;  %v111_v11 = vlaneseq  ;;  %s196_s3 = inlined_call_operand.vmem [shape: f32[1,1,128], index: 3, kind: output, shape index: {}]   ;;  %s197_s0 = inlined_call_operand.vmem [shape: f32[5,128], index: 0, kind: input, shape index: {}]   ;;  %s198_s1 = inlined_call_operand.vmem [shape: s32[1,128], index: 1, kind: input, shape index: {}]   ;;  %s199_s2 = inlined_call_operand.vmem [shape: s8[1,128], index: 2, kind: input, shape index: {}]  }
   0x1   :  { %83 = vst [vmem:[%s196_s3] sm:$0x1] %v154_v0  ;;  %v84_v1 = vld [vmem:[%s197_s0] sm:$0x1f] }
   0x2   :  { %v91_v2 = vsel %vm90_vm0, %v84_v1, -inf  ;;  %v112_v12 = vshrl.u32 %v111_v11, 7  ;;  %v148_v13 = vld [vmem:[%s198_s1] ss:$0 sm:$0xff] }
   0x3   :  { %v92_v3 = vrot.slane %v91_v2, 4  ;;  %v86_v27 = vld [vmem:[%s199_s2] sm:$0x1] }
   0x4   :  { %vm117_vm1 = vcmp.eq.s32.totalorder %v112_v12, %v148_v13  ;;  %v87_v29 = vunpack.c.0.s8 %v86_v27 }
   0x5   :  { %v93_v4 = vmax.f32 %v91_v2, %v92_v3  ;;  %v118_v14 = vsel %vm117_vm1, %v84_v1, 0.0 }
   0x6   :  { %v119_v18 = vsel %vm90_vm0, %v118_v14, 0.0  ;;  %v88_v32 = vcvt.s32.f32 %v87_v29 }
   0x7   :  { %v94_v5 = vrot.slane %v93_v4, 2  ;;  %v120_v20 = vrot.slane %v119_v18, 4 }
   0x8   :  { %vm89_vm2 = vcmp.gt.f32.partialorder %v88_v32, 0.0  ;;  %v128_v38 = vld [vmem:[%s196_s3] sm:$0x1] }
   0x9   :  { %v95_v6 = vmax.f32 %v93_v4, %v94_v5  ;;  %v121_v23 = vadd.f32 %v120_v20, %v119_v18 }
   0xb   :  { %v96_v7 = vrot.slane %v95_v6, 1  ;;  %v122_v26 = vrot.slane %v121_v23, 2 }
   0xd   :  { %v97_v8 = vmax.f32 %v95_v6, %v96_v7  ;;  %v123_v28 = vadd.f32 %v122_v26, %v121_v23 }
   0xf   :  { %v98_v9 = vsub.f32 %v84_v1, %v97_v8  ;;  %v124_v30 = vrot.slane %v123_v28, 1 }
  0x11   :  { %v99_v10 = vmul.f32 1.442695, %v98_v9  ;;  %v125_v34 = vadd.f32 %v124_v30, %v123_v28 }
  0x13   :  { %150 = vpow2.f32 %v99_v10 }
  0x1d   :  { %v151_v15 = vpop.eup %150 }
  0x1e   :  { %v101_v16 = vsel %vm90_vm0, %v151_v15, 0.0 }
  0x1f   :  { %v102_v17 = vrot.slane %v101_v16, 4 }
  0x21   :  { %v103_v19 = vadd.f32 %v102_v17, %v101_v16 }
  0x23   :  { %v104_v21 = vrot.slane %v103_v19, 2 }
  0x25   :  { %v105_v22 = vadd.f32 %v104_v21, %v103_v19 }
  0x27   :  { %v106_v24 = vrot.slane %v105_v22, 1 }
  0x29   :  { %v107_v25 = vadd.f32 %v106_v24, %v105_v22 }
  0x2b   :  { %152 = vlog2.f32 %v107_v25 }
  0x35   :  { %v153_v31 = vpop.eup %152 }
  0x36   :  { %v109_v33 = vmul.f32 0.6931472, %v153_v31 }
  0x38   :  { %v110_v35 = vadd.f32 %v109_v33, %v97_v8 }
  0x3a   :  { %v126_v36 = vsub.f32 %v110_v35, %v125_v34 }
  0x3c   :  { %v127_v37 = vsel %vm89_vm2, %v126_v36, 0.0 }
  0x3d   :  { %v129_v39 = vmul.f32 %v127_v37, %v88_v32 }
  0x3f   :  { %v130_v40 = vadd.f32 %v129_v39, %v128_v38 }
  0x41   :  { %131 = vst [vmem:[%s196_s3] sm:$0x1] %v130_v40 }

// kernel: val_loss.3
= control target key start
LH: loop header
LB: loop body
LE: loop exit
PB: predicated region body
PF: predicated region fallthrough
CT: control target
= control target key end

     0   :  { %v158_v0 = vmov 0.0   ;;  %v116_v11 = vlaneseq  ;;  %vm89_vm0 = vcmask 1042432   ;;  %s197_s3 = inlined_call_operand.vmem [shape: f32[1,3,128], index: 3, kind: output, shape index: {}]   ;;  %s198_s0 = inlined_call_operand.vmem [shape: f32[8,34], index: 0, kind: input, shape index: {}]   ;;  %s199_s2 = inlined_call_operand.vmem [shape: s8[3,128], index: 2, kind: input, shape index: {}]   ;;  %s200_s1 = inlined_call_operand.vmem [shape: s32[1,34], index: 1, kind: input, shape index: {}]  }
   0x1   :  { %83 = vst [vmem:[%s197_s3] sm:$0x7] %v158_v0  ;;  %v84_v1 = vld [vmem:[%s198_s0] sm:$0xff] }
   0x2   :  { %v98_v2 = vrot.slane %v84_v1, 4  ;;  %v86_v10 = vld [vmem:[%s199_s2] sm:$0x1]  ;;  %v117_v13 = vshrl.u32 %v116_v11, 7 }
   0x3   :  { %v87_v12 = vunpack.c.0.s8 %v86_v10  ;;  %v152_v14 = vld [vmem:[%s200_s1] ss:$0 sm:$0xff] }
   0x4   :  { %v99_v3 = vmax.f32 %v84_v1, %v98_v2  ;;  %vm122_vm1 = vcmp.eq.s32.totalorder %v117_v13, %v152_v14 }
   0x5   :  { %v88_v15 = vcvt.s32.f32 %v87_v12  ;;  %v123_v19 = vsel %vm122_vm1, %v84_v1, 0.0 }
   0x6   :  { %v100_v4 = vrot.slane %v99_v3, 2  ;;  %v124_v22 = vrot.slane %v123_v19, 4 }
   0x7   :  { %v90_v17 = vsel %vm89_vm0, %v88_v15, -inf }
   0x8   :  { %v101_v5 = vmax.f32 %v99_v3, %v100_v4  ;;  %v91_v20 = vrot.slane %v90_v17, 4  ;;  %v125_v26 = vadd.f32 %v124_v22, %v123_v19  ;;  %v132_v42 = vld [vmem:[%s197_s3] sm:$0x7] }
   0xa   :  { %v102_v6 = vrot.slane %v101_v5, 1  ;;  %v92_v24 = vmax.f32 %v90_v17, %v91_v20  ;;  %v126_v30 = vrot.slane %v125_v26, 2 }
   0xc   :  { %v103_v7 = vmax.f32 %v101_v5, %v102_v6  ;;  %v93_v28 = vrot.slane %v92_v24, 2  ;;  %v127_v32 = vadd.f32 %v126_v30, %v125_v26 }
   0xe   :  { %v104_v8 = vsub.f32 %v84_v1, %v103_v7  ;;  %v94_v31 = vmax.f32 %v92_v24, %v93_v28  ;;  %v128_v34 = vrot.slane %v127_v32, 1 }
  0x10   :  { %v105_v9 = vmul.f32 1.442695, %v104_v8  ;;  %v95_v33 = vrot.slane %v94_v31, 1  ;;  %v129_v38 = vadd.f32 %v128_v34, %v127_v32 }
  0x12   :  { %154 = vpow2.f32 %v105_v9  ;;  %v96_v36 = vmax.f32 %v94_v31, %v95_v33 }
  0x14   :  { %vm97_vm2 = vcmp.gt.f32.partialorder %v96_v36, 0.0 }
  0x1c   :  { %v155_v16 = vpop.eup %154 }
  0x1d   :  { %v107_v18 = vrot.slane %v155_v16, 4 }
  0x1f   :  { %v108_v21 = vadd.f32 %v155_v16, %v107_v18 }
  0x21   :  { %v109_v23 = vrot.slane %v108_v21, 2 }
  0x23   :  { %v110_v25 = vadd.f32 %v109_v23, %v108_v21 }
  0x25   :  { %v111_v27 = vrot.slane %v110_v25, 1 }
  0x27   :  { %v112_v29 = vadd.f32 %v111_v27, %v110_v25 }
  0x29   :  { %156 = vlog2.f32 %v112_v29 }
  0x33   :  { %v157_v35 = vpop.eup %156 }
  0x34   :  { %v114_v37 = vmul.f32 0.6931472, %v157_v35 }
  0x36   :  { %v115_v39 = vadd.f32 %v114_v37, %v103_v7 }
  0x38   :  { %v130_v40 = vsub.f32 %v115_v39, %v129_v38 }
  0x3a   :  { %v131_v41 = vsel %vm97_vm2, %v130_v40, 0.0 }
  0x3b   :  { %v133_v43 = vmul.f32 %v131_v41, %v88_v15 }
  0x3d   :  { %v134_v44 = vadd.f32 %v133_v43, %v132_v42 }
  0x3f   :  { %135 = vst [vmem:[%s197_s3] sm:$0x7] %v134_v44 }

</bundles_post_ra>
